<compile_context>
chip_gen: v7x
topology: tpu7x:2x2x1
jax: 0.10.0
libtpu: 0.0.40
codegen_flags: <defaults>
</compile_context>

<pallas_src>
import functools

import jax
import jax.numpy as jnp
from jax import lax
from jax.experimental import pallas as pl
from jax.experimental.pallas import tpu as pltpu


# ----------------------------------------------------------------------------
# Kernel 1: fused q/v projection + attention + (x - x_r) + trans_conv
# ----------------------------------------------------------------------------
def _attn_kernel(x_ref, wqv_ref, bqv_ref, wt_ref, bt_ref, t_ref, q_ref, v_ref,
                 *, n_pts, n_batch, c, c4):
    # x_ref  : (C, Bt*N) f32          wqv_ref: (C4+C, C) bf16
    # bqv_ref: (C4+C, 1) f32          wt_ref : (C, C) bf16   bt_ref: (C, 1) f32
    # t_ref  : (C, Bt*N) bf16 output
    # q_ref  : (C4, Bt*N) bf16 scratch, v_ref: (C, Bt*N) bf16 scratch
    x_bf = x_ref[...].astype(jnp.bfloat16)

    # Fused q/v projection: one MXU matmul with lane width Bt*N.
    qv = jnp.dot(wqv_ref[...], x_bf, preferred_element_type=jnp.float32)
    qv = qv + bqv_ref[...]
    q_ref[...] = qv[:c4].astype(jnp.bfloat16)
    v_ref[...] = qv[c4:].astype(jnp.bfloat16)

    def body(b, carry):
        col = pl.multiple_of(b * n_pts, n_pts)
        q = q_ref[:, pl.ds(col, n_pts)]                       # (C4, N) bf16
        v = v_ref[:, pl.ds(col, n_pts)]                       # (C,  N) bf16

        # energy[n, m] = sum_c q[c, n] * q[c, m]  (q_conv and k_conv share W)
        energy = lax.dot_general(q, q, (((0,), (0,)), ((), ())),
                                 preferred_element_type=jnp.float32)  # (N, N)

        # Row softmax; reciprocal on the EUP; cast to bf16 right away so at
        # most one f32 (N, N) temporary stays live.
        p = jnp.exp(energy - jnp.max(energy, axis=-1, keepdims=True))
        row_inv = pl.reciprocal(jnp.sum(p, axis=-1, keepdims=True), approx=True)
        attn = (p * row_inv).astype(jnp.bfloat16)

        # Column renorm folded AFTER the matmul (per-column scale).
        colsum = jnp.sum(attn, axis=0, keepdims=True, dtype=jnp.float32)  # (1, N)
        xr = jnp.dot(v, attn, preferred_element_type=jnp.float32)         # (C, N)
        xr = xr * pl.reciprocal(1e-9 + colsum, approx=True)

        xb = x_ref[:, pl.ds(col, n_pts)]                                  # (C, N) f32
        # Stage y = x - x_r into the output block (reused as scratch).
        t_ref[:, pl.ds(col, n_pts)] = (xb - xr).astype(jnp.bfloat16)
        return carry

    lax.fori_loop(0, n_batch, body, 0, unroll=bool(n_pts <= 256))

    # trans_conv over all Bt batches at once (lane width Bt*N).
    y = t_ref[...]
    t = jnp.dot(wt_ref[...], y, preferred_element_type=jnp.float32) + bt_ref[...]
    t_ref[...] = t.astype(t_ref.dtype)


# ----------------------------------------------------------------------------
# Kernel 2: BatchNorm1d (training-mode batch statistics) + ReLU + residual add
# Grid over channel blocks spanning the full (B*N) extent -> exact statistics.
# ----------------------------------------------------------------------------
def _bn_relu_res_kernel(t_ref, x_ref, g_ref, b_ref, o_ref, *, eps, inv_count):
    t = t_ref[...].astype(jnp.float32)            # (cb, B*N)
    mean = jnp.sum(t, axis=1, keepdims=True) * inv_count
    d = t - mean                                  # two-pass (centered) variance
    var = jnp.sum(d * d, axis=1, keepdims=True) * inv_count
    scale = g_ref[...] * lax.rsqrt(var + eps)     # (cb, 1)
    xn = d * scale + b_ref[...]
    o_ref[...] = x_ref[...] + jnp.maximum(xn, 0.0)


# ----------------------------------------------------------------------------
# Generation-aware VMEM budgets & block-size heuristics
# ----------------------------------------------------------------------------
def _tpu_vmem_limits():
    try:
        cap = int(getattr(pltpu.get_tpu_info(), "vmem_capacity_bytes", 64 << 20))
    except Exception:
        cap = 64 << 20
    # Request ~64 MiB of scoped VMEM on 128 MiB parts (v5e/v6e), ~40 MiB on
    # 64 MiB parts (v7x); keep headroom for compiler-internal scratch.
    limit = max(32 << 20, min(64 << 20, (cap * 5) // 8))
    return cap, limit


def _pick_bt(B, C, C4, N, budget_bytes, max_bt=8):
    """Largest divisor of B (<= max_bt) whose kernel-1 working set fits."""
    def k1_bytes(bt):
        slab = bt * N
        return (2 * C * slab * 4          # x input block (double-buffered, f32)
                + 2 * C * slab * 2        # t output block (double-buffered, bf16)
                + C4 * slab * 2           # q scratch (bf16)
                + C * slab * 2            # v scratch (bf16)
                + 10 * N * N              # attention temporaries (one batch live)
                + 4 * (C4 + 2 * C) * C)   # weights (bf16, double-buffered)
    best = 1
    for cand in range(1, min(B, max_bt) + 1):
        if B % cand == 0 and k1_bytes(cand) <= budget_bytes:
            best = cand
    return best


def _pick_cb(C, BN, budget_bytes, vmem_cap):
    """Largest channel block (multiple of 8 dividing C, or C itself) whose
    kernel-2 working set fits.  Kernel 2 is HBM-bandwidth bound, so bigger is
    better up to the budget."""
    per_c = 2 * BN * (2 + 4 + 4)          # t(bf16) + x(f32) + out(f32), x2 buffers
    cands = [c for c in range(8, C, 8) if C % c == 0] + [C]
    fit = [c for c in cands if c * per_c <= budget_bytes]
    cb = max(fit) if fit else min(cands)
    # On 64 MiB / 2-TensorCore parts (v7x) keep >= 2 grid steps so both cores
    # share the memory-bound BN pass.
    if cb == C and vmem_cap <= (64 << 20) and C % 2 == 0 and (C // 2) % 8 == 0:
        cb = C // 2
    return cb


# ----------------------------------------------------------------------------
# Wrapper
# ----------------------------------------------------------------------------
def sa_layer_pallas(x, wq, wv, bv, wt, bt, gamma, beta, *, eps=1e-5,
                    bt_batches=None, cb=None):
    B, C, N = x.shape
    C4 = wq.shape[0]
    assert N % 128 == 0, "point count must be a multiple of 128 (lane width)"
    assert C % 8 == 0

    vmem_cap, vmem_limit = _tpu_vmem_limits()
    budget = vmem_limit - (8 << 20)

    Bt = bt_batches if bt_batches is not None else _pick_bt(B, C, C4, N, budget)
    assert B % Bt == 0
    cb = cb if cb is not None else _pick_cb(C, B * N, budget, vmem_cap)
    assert C % cb == 0

    # Channel-major slab layout: (C, B*N); lane dimension is B*N (lane-dense).
    x2 = jnp.transpose(x, (1, 0, 2)).reshape(C, B * N)

    # Stack q/v projection weights (q_conv has no bias) and pre-cast to bf16.
    wqv = jnp.concatenate([wq, wv], axis=0).astype(jnp.bfloat16)       # (C4+C, C)
    bqv = jnp.concatenate([jnp.zeros((C4, 1), jnp.float32), bv], axis=0)
    wt_bf = wt.astype(jnp.bfloat16)

    cparams = pltpu.CompilerParams(
        dimension_semantics=("parallel",),
        vmem_limit_bytes=vmem_limit,
    )

    slab = Bt * N

    # ---- kernel 1: fused projection + attention + trans_conv ---------------
    t2 = pl.pallas_call(
        functools.partial(_attn_kernel, n_pts=N, n_batch=Bt, c=C, c4=C4),
        out_shape=jax.ShapeDtypeStruct((C, B * N), jnp.bfloat16),
        grid_spec=pltpu.PrefetchScalarGridSpec(
            num_scalar_prefetch=0,
            grid=(B // Bt,),
            in_specs=[
                pl.BlockSpec((C, slab), lambda g: (0, g)),
                pl.BlockSpec((C4 + C, C), lambda g: (0, 0)),
                # biases are tiny (lane-padded) blocks; cost is negligible
                pl.BlockSpec((C4 + C, 1), lambda g: (0, 0)),
                pl.BlockSpec((C, C), lambda g: (0, 0)),
                pl.BlockSpec((C, 1), lambda g: (0, 0)),
            ],
            out_specs=pl.BlockSpec((C, slab), lambda g: (0, g)),
            scratch_shapes=[
                pltpu.VMEM((C4, slab), jnp.bfloat16),
                pltpu.VMEM((C, slab), jnp.bfloat16),
            ],
        ),
        compiler_params=cparams,
    )(x2, wqv, bqv, wt_bf, bt)

    # ---- kernel 2: batch-norm (training stats) + relu + residual -----------
    out2 = pl.pallas_call(
        functools.partial(_bn_relu_res_kernel, eps=eps, inv_count=1.0 / (B * N)),
        out_shape=jax.ShapeDtypeStruct((C, B * N), jnp.float32),
        grid_spec=pltpu.PrefetchScalarGridSpec(
            num_scalar_prefetch=0,
            grid=(C // cb,),
            in_specs=[
                pl.BlockSpec((cb, B * N), lambda i: (i, 0)),
                pl.BlockSpec((cb, B * N), lambda i: (i, 0)),
                pl.BlockSpec((cb, 1), lambda i: (i, 0)),
                pl.BlockSpec((cb, 1), lambda i: (i, 0)),
            ],
            out_specs=pl.BlockSpec((cb, B * N), lambda i: (i, 0)),
        ),
        compiler_params=cparams,
    )(t2, x2, gamma, beta)

    return out2.reshape(C, B, N).transpose(1, 0, 2)


# ----------------------------------------------------------------------------
# Pure-JAX reference (mirrors the torch forward exactly, training-mode BN, f32)
# ----------------------------------------------------------------------------
def sa_layer_reference(x, wq, wv, bv, wt, bt, gamma, beta, eps=1e-5):
    q = jnp.einsum("oc,bcn->bon", wq, x)                 # (B, C4, N)
    k = q                                                # shared weight
    v = jnp.einsum("oc,bcn->bon", wv, x) + bv[None]      # (B, C, N)
    x_q = jnp.transpose(q, (0, 2, 1))                    # (B, N, C4)
    energy = jnp.einsum("bnc,bcm->bnm", x_q, k)          # (B, N, N)
    attn = jax.nn.softmax(energy, axis=-1)
    attn = attn / (1e-9 + jnp.sum(attn, axis=1, keepdims=True))
    x_r = jnp.einsum("bcn,bnm->bcm", v, attn)            # (B, C, N)
    y = x - x_r
    t = jnp.einsum("oc,bcn->bon", wt, y) + bt[None]
    mean = jnp.mean(t, axis=(0, 2), keepdims=True)
    var = jnp.mean((t - mean) ** 2, axis=(0, 2), keepdims=True)
    xn = (t - mean) * jax.lax.rsqrt(var + eps) * gamma.reshape(1, -1, 1) \
         + beta.reshape(1, -1, 1)
    return x + jnp.maximum(xn, 0.0)


if __name__ == "__main__":
    B, C, N = 2, 32, 128
    C4 = C // 4

    key = jax.random.PRNGKey(0)
    kx, kq, kv, kbv, kt, kbt, kg, kb = jax.random.split(key, 8)

    # deterministic synthetic parameters (q_conv.weight is shared with k_conv)
    x = jax.random.normal(kx, (B, C, N), dtype=jnp.float32)
    wq = jax.random.normal(kq, (C4, C), dtype=jnp.float32) * 0.1   # q/k shared weight
    wv = jax.random.normal(kv, (C, C), dtype=jnp.float32) * 0.1
    bv = jax.random.normal(kbv, (C, 1), dtype=jnp.float32) * 0.1
    wt = jax.random.normal(kt, (C, C), dtype=jnp.float32) * 0.1
    bt = jax.random.normal(kbt, (C, 1), dtype=jnp.float32) * 0.1
    gamma = 1.0 + 0.1 * jax.random.normal(kg, (C, 1), dtype=jnp.float32)
    beta = 0.1 * jax.random.normal(kb, (C, 1), dtype=jnp.float32)

    out = sa_layer_pallas(x, wq, wv, bv, wt, bt, gamma, beta)
    out = jax.block_until_ready(out)

    ref = sa_layer_reference(x, wq, wv, bv, wt, bt, gamma, beta)
    assert out.shape == (B, C, N)
    # bf16 MXU operands, bf16 intermediate t, approx reciprocals -> relaxed tol
    assert jnp.allclose(out, ref, atol=5e-2, rtol=5e-2), "mismatch vs reference"

    print("KERNEL_OK")
</pallas_src>

<mosaic_0001>
module attributes {stable_mosaic.version = 11 : i64} {
  func.func @_attn_kernel(%arg0: i32, %arg1: memref<32x256xf32, #tpu.memory_space<vmem>>, %arg2: memref<40x32xbf16, #tpu.memory_space<vmem>>, %arg3: memref<40x1xf32, #tpu.memory_space<vmem>>, %arg4: memref<32x32xbf16, #tpu.memory_space<vmem>>, %arg5: memref<32x1xf32, #tpu.memory_space<vmem>>, %arg6: memref<32x256xbf16, #tpu.memory_space<vmem>>, %arg7: memref<8x256xbf16, #tpu.memory_space<vmem>>, %arg8: memref<32x256xbf16, #tpu.memory_space<vmem>>) attributes {dimension_semantics = [#tpu.dimension_semantics<parallel>], iteration_bounds = array<i64: 1>, scalar_prefetch = 0 : i64, scratch_operands = 2 : i64, tpu.core_type = #tpu.core_type<tc>, window_params = [{transform_indices = @transform_0, window_bounds = array<i64: 32, 256>}, {pipeline_mode = #tpu.pipeline_mode<synchronous>, transform_indices = @transform_1, window_bounds = array<i64: 40, 32>}, {pipeline_mode = #tpu.pipeline_mode<synchronous>, transform_indices = @transform_2, window_bounds = array<i64: 40, 1>}, {pipeline_mode = #tpu.pipeline_mode<synchronous>, transform_indices = @transform_3, window_bounds = array<i64: 32, 32>}, {pipeline_mode = #tpu.pipeline_mode<synchronous>, transform_indices = @transform_4, window_bounds = array<i64: 32, 1>}, {transform_indices = @transform_5, window_bounds = array<i64: 32, 256>}]} {
    %c0 = arith.constant 0 : index
    %c0_0 = arith.constant 0 : index
    %0 = vector.load %arg1[%c0, %c0_0] : memref<32x256xf32, #tpu.memory_space<vmem>>, vector<32x256xf32>
    %1 = arith.truncf %0 : vector<32x256xf32> to vector<32x256xbf16>
    %c0_1 = arith.constant 0 : index
    %c0_2 = arith.constant 0 : index
    %2 = vector.load %arg2[%c0_1, %c0_2] : memref<40x32xbf16, #tpu.memory_space<vmem>>, vector<40x32xbf16>
    %cst = arith.constant dense<0.000000e+00> : vector<40x256xf32>
    %3 = tpu.matmul %2, %1, %cst {dimension_numbers = #tpu.dot_dimension_numbers<[1], [0], [0], [1], [0, 0, 1, 1], [], []>} : vector<40x32xbf16>, vector<32x256xbf16>, vector<40x256xf32> -> vector<40x256xf32>
    %c0_3 = arith.constant 0 : index
    %c0_4 = arith.constant 0 : index
    %4 = vector.load %arg3[%c0_3, %c0_4] : memref<40x1xf32, #tpu.memory_space<vmem>>, vector<40x1xf32>
    %5 = vector.broadcast %4 : vector<40x1xf32> to vector<40x256xf32>
    %6 = arith.addf %3, %5 : vector<40x256xf32>
    %7 = vector.extract_strided_slice %6 {offsets = [0, 0], sizes = [8, 256], strides = [1, 1]} : vector<40x256xf32> to vector<8x256xf32>
    %8 = arith.truncf %7 : vector<8x256xf32> to vector<8x256xbf16>
    %c0_5 = arith.constant 0 : index
    %c0_6 = arith.constant 0 : index
    %9 = vector.load %arg7[%c0_5, %c0_6] : memref<8x256xbf16, #tpu.memory_space<vmem>>, vector<8x256xbf16>
    tpu.vector_store %arg7[%c0_5, %c0_6], %8 {strides = array<i32>} : memref<8x256xbf16, #tpu.memory_space<vmem>>, vector<8x256xbf16>,
    %10 = vector.extract_strided_slice %6 {offsets = [8, 0], sizes = [32, 256], strides = [1, 1]} : vector<40x256xf32> to vector<32x256xf32>
    %11 = arith.truncf %10 : vector<32x256xf32> to vector<32x256xbf16>
    %c0_7 = arith.constant 0 : index
    %c0_8 = arith.constant 0 : index
    %12 = vector.load %arg8[%c0_7, %c0_8] : memref<32x256xbf16, #tpu.memory_space<vmem>>, vector<32x256xbf16>
    tpu.vector_store %arg8[%c0_7, %c0_8], %11 {strides = array<i32>} : memref<32x256xbf16, #tpu.memory_space<vmem>>, vector<32x256xbf16>,
    %c0_i32 = arith.constant 0 : i32
    %c128_i32 = arith.constant 128 : i32
    %13 = arith.muli %c0_i32, %c128_i32 : i32
    %14 = tpu.assume_multiple %13, 128 : i32
    %c0_9 = arith.constant 0 : index
    %15 = arith.index_cast %14 : i32 to index
    %16 = vector.load %arg7[%c0_9, %15] : memref<8x256xbf16, #tpu.memory_space<vmem>>, vector<8x128xbf16>
    %c0_10 = arith.constant 0 : index
    %17 = arith.index_cast %14 : i32 to index
    %18 = vector.load %arg8[%c0_10, %17] : memref<32x256xbf16, #tpu.memory_space<vmem>>, vector<32x128xbf16>
    %cst_11 = arith.constant dense<0.000000e+00> : vector<128x128xf32>
    %19 = tpu.matmul %16, %16, %cst_11 {dimension_numbers = #tpu.dot_dimension_numbers<[0], [0], [1], [1], [0, 1, 1, 1], [], []>} : vector<8x128xbf16>, vector<8x128xbf16>, vector<128x128xf32> -> vector<128x128xf32>
    %cst_12 = arith.constant dense<0xFF800000> : vector<128xf32>
    %20 = vector.multi_reduction <maximumf>, %19, %cst_12 [1] : vector<128x128xf32> to vector<128xf32>
    %21 = vector.shape_cast %20 : vector<128xf32> to vector<128x1xf32>
    %22 = vector.broadcast %21 : vector<128x1xf32> to vector<128x128xf32>
    %23 = arith.subf %19, %22 : vector<128x128xf32>
    %24 = math.exp %23 : vector<128x128xf32>
    %cst_13 = arith.constant dense<0.000000e+00> : vector<128xf32>
    %25 = vector.multi_reduction <add>, %24, %cst_13 [1] : vector<128x128xf32> to vector<128xf32>
    %26 = vector.shape_cast %25 : vector<128xf32> to vector<128x1xf32>
    %27 = tpu.reciprocal %26 {approx = true} : vector<128x1xf32> -> vector<128x1xf32>
    %28 = vector.broadcast %27 : vector<128x1xf32> to vector<128x128xf32>
    %29 = arith.mulf %24, %28 : vector<128x128xf32>
    %30 = arith.truncf %29 : vector<128x128xf32> to vector<128x128xbf16>
    %31 = arith.extf %30 : vector<128x128xbf16> to vector<128x128xf32>
    %cst_14 = arith.constant dense<0.000000e+00> : vector<128xf32>
    %32 = vector.multi_reduction <add>, %31, %cst_14 [0] : vector<128x128xf32> to vector<128xf32>
    %33 = vector.shape_cast %32 : vector<128xf32> to vector<1x128xf32>
    %cst_15 = arith.constant dense<0.000000e+00> : vector<32x128xf32>
    %34 = tpu.matmul %18, %30, %cst_15 {dimension_numbers = #tpu.dot_dimension_numbers<[1], [0], [0], [1], [0, 0, 1, 1], [], []>} : vector<32x128xbf16>, vector<128x128xbf16>, vector<32x128xf32> -> vector<32x128xf32>
    %cst_16 = arith.constant 9.99999971E-10 : f32
    %35 = vector.broadcast %cst_16 : f32 to vector<1x128xf32>
    %36 = arith.addf %35, %33 : vector<1x128xf32>
    %37 = tpu.reciprocal %36 {approx = true} : vector<1x128xf32> -> vector<1x128xf32>
    %38 = vector.broadcast %37 : vector<1x128xf32> to vector<32x128xf32>
    %39 = arith.mulf %34, %38 : vector<32x128xf32>
    %c0_17 = arith.constant 0 : index
    %40 = arith.index_cast %14 : i32 to index
    %41 = vector.load %arg1[%c0_17, %40] : memref<32x256xf32, #tpu.memory_space<vmem>>, vector<32x128xf32>
    %42 = arith.subf %41, %39 : vector<32x128xf32>
    %43 = arith.truncf %42 : vector<32x128xf32> to vector<32x128xbf16>
    %c0_18 = arith.constant 0 : index
    %44 = arith.index_cast %14 : i32 to index
    %45 = vector.load %arg6[%c0_18, %44] : memref<32x256xbf16, #tpu.memory_space<vmem>>, vector<32x128xbf16>
    tpu.vector_store %arg6[%c0_18, %44], %43 {strides = array<i32>} : memref<32x256xbf16, #tpu.memory_space<vmem>>, vector<32x128xbf16>,
    %c1_i32 = arith.constant 1 : i32
    %c128_i32_19 = arith.constant 128 : i32
    %46 = arith.muli %c1_i32, %c128_i32_19 : i32
    %47 = tpu.assume_multiple %46, 128 : i32
    %c0_20 = arith.constant 0 : index
    %48 = arith.index_cast %47 : i32 to index
    %49 = vector.load %arg7[%c0_20, %48] : memref<8x256xbf16, #tpu.memory_space<vmem>>, vector<8x128xbf16>
    %c0_21 = arith.constant 0 : index
    %50 = arith.index_cast %47 : i32 to index
    %51 = vector.load %arg8[%c0_21, %50] : memref<32x256xbf16, #tpu.memory_space<vmem>>, vector<32x128xbf16>
    %cst_22 = arith.constant dense<0.000000e+00> : vector<128x128xf32>
    %52 = tpu.matmul %49, %49, %cst_22 {dimension_numbers = #tpu.dot_dimension_numbers<[0], [0], [1], [1], [0, 1, 1, 1], [], []>} : vector<8x128xbf16>, vector<8x128xbf16>, vector<128x128xf32> -> vector<128x128xf32>
    %cst_23 = arith.constant dense<0xFF800000> : vector<128xf32>
    %53 = vector.multi_reduction <maximumf>, %52, %cst_23 [1] : vector<128x128xf32> to vector<128xf32>
    %54 = vector.shape_cast %53 : vector<128xf32> to vector<128x1xf32>
    %55 = vector.broadcast %54 : vector<128x1xf32> to vector<128x128xf32>
    %56 = arith.subf %52, %55 : vector<128x128xf32>
    %57 = math.exp %56 : vector<128x128xf32>
    %cst_24 = arith.constant dense<0.000000e+00> : vector<128xf32>
    %58 = vector.multi_reduction <add>, %57, %cst_24 [1] : vector<128x128xf32> to vector<128xf32>
    %59 = vector.shape_cast %58 : vector<128xf32> to vector<128x1xf32>
    %60 = tpu.reciprocal %59 {approx = true} : vector<128x1xf32> -> vector<128x1xf32>
    %61 = vector.broadcast %60 : vector<128x1xf32> to vector<128x128xf32>
    %62 = arith.mulf %57, %61 : vector<128x128xf32>
    %63 = arith.truncf %62 : vector<128x128xf32> to vector<128x128xbf16>
    %64 = arith.extf %63 : vector<128x128xbf16> to vector<128x128xf32>
    %cst_25 = arith.constant dense<0.000000e+00> : vector<128xf32>
    %65 = vector.multi_reduction <add>, %64, %cst_25 [0] : vector<128x128xf32> to vector<128xf32>
    %66 = vector.shape_cast %65 : vector<128xf32> to vector<1x128xf32>
    %cst_26 = arith.constant dense<0.000000e+00> : vector<32x128xf32>
    %67 = tpu.matmul %51, %63, %cst_26 {dimension_numbers = #tpu.dot_dimension_numbers<[1], [0], [0], [1], [0, 0, 1, 1], [], []>} : vector<32x128xbf16>, vector<128x128xbf16>, vector<32x128xf32> -> vector<32x128xf32>
    %cst_27 = arith.constant 9.99999971E-10 : f32
    %68 = vector.broadcast %cst_27 : f32 to vector<1x128xf32>
    %69 = arith.addf %68, %66 : vector<1x128xf32>
    %70 = tpu.reciprocal %69 {approx = true} : vector<1x128xf32> -> vector<1x128xf32>
    %71 = vector.broadcast %70 : vector<1x128xf32> to vector<32x128xf32>
    %72 = arith.mulf %67, %71 : vector<32x128xf32>
    %c0_28 = arith.constant 0 : index
    %73 = arith.index_cast %47 : i32 to index
    %74 = vector.load %arg1[%c0_28, %73] : memref<32x256xf32, #tpu.memory_space<vmem>>, vector<32x128xf32>
    %75 = arith.subf %74, %72 : vector<32x128xf32>
    %76 = arith.truncf %75 : vector<32x128xf32> to vector<32x128xbf16>
    %c0_29 = arith.constant 0 : index
    %77 = arith.index_cast %47 : i32 to index
    %78 = vector.load %arg6[%c0_29, %77] : memref<32x256xbf16, #tpu.memory_space<vmem>>, vector<32x128xbf16>
    tpu.vector_store %arg6[%c0_29, %77], %76 {strides = array<i32>} : memref<32x256xbf16, #tpu.memory_space<vmem>>, vector<32x128xbf16>,
    %c2_i32 = arith.constant 2 : i32
    %c0_30 = arith.constant 0 : index
    %c0_31 = arith.constant 0 : index
    %79 = vector.load %arg6[%c0_30, %c0_31] : memref<32x256xbf16, #tpu.memory_space<vmem>>, vector<32x256xbf16>
    %c0_32 = arith.constant 0 : index
    %c0_33 = arith.constant 0 : index
    %80 = vector.load %arg4[%c0_32, %c0_33] : memref<32x32xbf16, #tpu.memory_space<vmem>>, vector<32x32xbf16>
    %cst_34 = arith.constant dense<0.000000e+00> : vector<32x256xf32>
    %81 = tpu.matmul %80, %79, %cst_34 {dimension_numbers = #tpu.dot_dimension_numbers<[1], [0], [0], [1], [0, 0, 1, 1], [], []>} : vector<32x32xbf16>, vector<32x256xbf16>, vector<32x256xf32> -> vector<32x256xf32>
    %c0_35 = arith.constant 0 : index
    %c0_36 = arith.constant 0 : index
    %82 = vector.load %arg5[%c0_35, %c0_36] : memref<32x1xf32, #tpu.memory_space<vmem>>, vector<32x1xf32>
    %83 = vector.broadcast %82 : vector<32x1xf32> to vector<32x256xf32>
    %84 = arith.addf %81, %83 : vector<32x256xf32>
    %85 = arith.truncf %84 : vector<32x256xf32> to vector<32x256xbf16>
    %c0_37 = arith.constant 0 : index
    %c0_38 = arith.constant 0 : index
    %86 = vector.load %arg6[%c0_37, %c0_38] : memref<32x256xbf16, #tpu.memory_space<vmem>>, vector<32x256xbf16>
    tpu.vector_store %arg6[%c0_37, %c0_38], %85 {strides = array<i32>} : memref<32x256xbf16, #tpu.memory_space<vmem>>, vector<32x256xbf16>,
    return
  }
  func.func @transform_0(%arg0: i32) -> (i32, i32) {
    %c0_i32 = arith.constant 0 : i32
    %c0_i32_0 = arith.constant 0 : i32
    return %c0_i32, %arg0 : i32, i32
  }
  func.func @transform_1(%arg0: i32) -> (i32, i32) {
    %c0_i32 = arith.constant 0 : i32
    %c0_i32_0 = arith.constant 0 : i32
    %c0_i32_1 = arith.constant 0 : i32
    return %c0_i32, %c0_i32_0 : i32, i32
  }
  func.func @transform_2(%arg0: i32) -> (i32, i32) {
    %c0_i32 = arith.constant 0 : i32
    %c0_i32_0 = arith.constant 0 : i32
    %c0_i32_1 = arith.constant 0 : i32
    return %c0_i32, %c0_i32_0 : i32, i32
  }
  func.func @transform_3(%arg0: i32) -> (i32, i32) {
    %c0_i32 = arith.constant 0 : i32
    %c0_i32_0 = arith.constant 0 : i32
    %c0_i32_1 = arith.constant 0 : i32
    return %c0_i32, %c0_i32_0 : i32, i32
  }
  func.func @transform_4(%arg0: i32) -> (i32, i32) {
    %c0_i32 = arith.constant 0 : i32
    %c0_i32_0 = arith.constant 0 : i32
    %c0_i32_1 = arith.constant 0 : i32
    return %c0_i32, %c0_i32_0 : i32, i32
  }
  func.func @transform_5(%arg0: i32) -> (i32, i32) {
    %c0_i32 = arith.constant 0 : i32
    %c0_i32_0 = arith.constant 0 : i32
    return %c0_i32, %arg0 : i32, i32
  }
}

</mosaic_0001>

<bundles_post_ra>
// kernel: tpu_custom_call.1
= control target key start
LH: loop header
LB: loop body
LE: loop exit
PB: predicated region body
PF: predicated region fallthrough
CT: control target
= control target key end

     0   :  { %v1520_v7 = vmov 0   ;;  %s1973_s0 = inlined_call_operand.vmem [shape: f32[32,256], index: 0, kind: input, shape index: {}]   ;;  %s1974_s1 = inlined_call_operand.vmem [shape: bf16[40,32], index: 1, kind: input, shape index: {}]   ;;  %s1975_s2 = inlined_call_operand.vmem [shape: f32[40,1], index: 2, kind: input, shape index: {}]   ;;  %s1976_s3 = inlined_call_operand.vmem [shape: bf16[32,32], index: 3, kind: input, shape index: {}]   ;;  %s1977_s4 = inlined_call_operand.vmem [shape: f32[32,1], index: 4, kind: input, shape index: {}]   ;;  %s1978_s5 = inlined_call_operand.hbm [shape: bf16[32,256], index: 5, kind: output, shape index: {}]  }
   0x1   :  { %v23_v0 = vld [vmem:[%s1973_s0 + $0x8] sm:$0xff]  ;;  %v25_v1 = vld [vmem:[%s1973_s0 + $0x18] sm:$0xff]  ;;  %v22_v2 = vld [vmem:[%s1973_s0] sm:$0xff]  ;;  %124 = vmatprep.mubr.bf16.mxu0 %v1520_v7  ;;  %1351 = vset.pattern.permute.xlu0 %v1520_v7 }
   0x2   :  { %v31_v3 = vpack.c.bf16 %v25_v1, %v23_v0  ;;  %v24_v4 = vld [vmem:[%s1973_s0 + $0x10] sm:$0xff]  ;;  %v27_v5 = vld [vmem:[%s1973_s0 + $0x28] sm:$0xff]  ;;  %v29_v6 = vld [vmem:[%s1973_s0 + $0x38] sm:$0xff] }
   0x3   :  { %v30_v8 = vpack.c.bf16 %v24_v4, %v22_v2  ;;  %v33_v9 = vpack.c.bf16 %v29_v6, %v27_v5  ;;  %v26_v10 = vld [vmem:[%s1973_s0 + $0x20] sm:$0xff]  ;;  %v28_v11 = vld [vmem:[%s1973_s0 + $0x30] sm:$0xff] }
   0x4   :  { %92 = vmatprep.subr.bf16.mxu0 %v31_v3  ;;  %v39_v12 = vld [vmem:[%s1975_s2] sm:$0xff]  ;;  %v32_v13 = vpack.c.bf16 %v28_v11, %v26_v10 }
   0x5   :  { %93 = vmatpush1.bf16.msra.mxu0 %v30_v8  ;;  %46 = vperm.xlu0 %1351, %v39_v12  }
   0x6   :  { %94 = vmatprep.subr.bf16.mxu0 %v33_v9 }
   0x7   :  { %10 = vsyncpa [#allocation5], 0  ;;  %v1353_v14 = vld [vmem:[%s1974_s1] sm:$0xff]   ;;  %vm82_vm0 = vcmask 261120   ;;  %v1354_v15 = vld [vmem:[%s1974_s1 + $0x8] sm:$0xff]   ;;  %vm214_vm1 = vcmask 1043456  }
   0x8   :  { %v1355_v16 = vld [vmem:[%s1974_s1 + $0x10] ss:$0 sps:$4 sm:$0xff]   ;;  %vm189_vm2 = vcmask 64512  }
   0x9   :  { %95 = vmatpush1.bf16.msra.mxu0 %v32_v13 }
   0xc   :  { %1174 = vmatmul.mubr.msk.bf16.vlgmr.msra.gmra.mrb[0].mxu0 %vm82_vm0, %v1353_v14 }
   0xd   :  { %134 = vmatprep.mubr.bf16.mxu0 %v1520_v7 }
  0x14   :  { %1175 = vmatmul.mubr.msk.bf16.gmra.mrb[4].mxu0 %vm82_vm0, %v1354_v15 }
  0x15   :  { %144 = vmatprep.mubr.bf16.mxu0 %v1520_v7 }
  0x1c   :  { %1176 = vmatmul.mubr.msk.bf16.gmra.mrb[8].mxu0 %vm82_vm0, %v1355_v16 }
  0x84   :  { %v47_v17 = vpop.permute.xlu0 %46 }
  0xdf   :  { %v126_v18 = vpop.f32.mrb[0].mxu0 }
  0xe0   :  { %v127_v19 = vadd.f32 %v126_v18, %v47_v17  ;;  %v128_v20 = vpop.f32.mrb[1].mxu0 }
  0xe1   :  { %v129_v21 = vadd.f32 %v128_v20, %v47_v17  ;;  %v1597_v22 = vpop.f32.mrb[2].mxu0 }
  0xe2   :  { %v1599_v23 = vpop.f32.mrb[3].mxu0 }
  0xe3   :  { %v1218_v24 = vpack.c.bf16 %v129_v21, %v127_v19 }
  0xe5   :  { %161 = vst [vmem:[#allocation2] sm:$0xff] %v1218_v24  ;;  %v40_v24 = vld [vmem:[%s1975_s2 + $0x8] sm:$0xff] }
  0xe7   :  { %v1602_v29 = vpop.f32.mrb[4].mxu0 }
  0xe8   :  { %v1604_v30 = vpop.f32.mrb[5].mxu0 }
  0xe9   :  { %v1606_v31 = vpop.f32.mrb[6].mxu0 }
  0xea   :  { %v1608_v32 = vpop.f32.mrb[7].mxu0 }
  0xec   :  { %v588_v25 = vld [vmem:[#allocation2 + $0x4] sm:$0xf]  ;;  %v170_v26 = vld [vmem:[#allocation2] sm:$0xf] }
  0xed   :  { %592 = vxpose.xlu1.c.b16.start.end [1/1] (short) %v588_v25, 128  ;;  %1346 = vmatprep.subr.msk.bf16.mxu0 %vm214_vm1, %v588_v25  ;;  %v216_v27 = vsel %vm214_vm1, %v170_v26, 0  ;;  %v633_v28 = vsel %vm214_vm1, %v588_v25, 0  ;;  %v41_v25 = vld [vmem:[%s1975_s2 + $0x10] sm:$0xff] }
  0xee   :  { %173 = vxpose.xlu0.c.b16.start.end [1/1] (short) %v170_v26, 128  ;;  %1345 = vmatprep.subr.msk.bf16.mxu1 %vm214_vm1, %v170_v26 }
  0xef   :  { %1270 = vmatpush3.bf16.msra.mxu1 %v216_v27  ;;  %1308 = vmatpush3.bf16.msra.mxu0 %v633_v28  ;;  %v1610_v33 = vpop.f32.mrb[8].mxu0 }
  0xf0   :  { %v1612_v34 = vpop.f32.mrb[9].mxu0 }
  0xf1   :  { %1352 = vset.pattern.permute.xlu1 %v1520_v7  ;;  %v150_v35 = vpop.f32.mrb[10].mxu0 }
  0xf2   :  { %v151_v36 = vpop.f32.mrb[11].mxu0 }
 0x153   :  { %v600_v37 = vpop.trf.xlu1 }
 0x154   :  { %v181_v38 = vpop.trf.xlu0  ;;  %1309 = vmatprep.mubr.msk.bf16.mxu0 %vm189_vm2, %v600_v37 }
 0x155   :  { %1271 = vmatprep.mubr.msk.bf16.mxu1 %vm189_vm2, %v181_v38 }
 0x157   :  { %v601_v39 = vpop.trf.xlu1 }
 0x158   :  { %v182_v40 = vpop.trf.xlu0  ;;  %1310 = vmatmul.mubr.msk.bf16.vlgmr.msra.gmra.mrb[12].mxu0 %vm189_vm2, %v601_v39 }
 0x159   :  { %1272 = vmatmul.mubr.msk.bf16.vlgmr.msra.gmra.mrb[0].mxu1 %vm189_vm2, %v182_v40 }
 0x15b   :  { %v602_v41 = vpop.trf.xlu1 }
 0x15c   :  { %v183_v42 = vpop.trf.xlu0  ;;  %1313 = vmatprep.mubr.msk.bf16.mxu0 %vm189_vm2, %v602_v41 }
 0x15d   :  { %1275 = vmatprep.mubr.msk.bf16.mxu1 %vm189_vm2, %v183_v42 }
 0x15f   :  { %v603_v43 = vpop.trf.xlu1 }
 0x160   :  { %v184_v44 = vpop.trf.xlu0  ;;  %1314 = vmatmul.mubr.msk.bf16.gmra.mrb[16].mxu0 %vm189_vm2, %v603_v43 }
 0x161   :  { %1276 = vmatmul.mubr.msk.bf16.gmra.mrb[4].mxu1 %vm189_vm2, %v184_v44 }
 0x163   :  { %v604_v45 = vpop.trf.xlu1 }
 0x164   :  { %v185_v46 = vpop.trf.xlu0  ;;  %1317 = vmatprep.mubr.msk.bf16.mxu0 %vm189_vm2, %v604_v45 }
 0x165   :  { %1279 = vmatprep.mubr.msk.bf16.mxu1 %vm189_vm2, %v185_v46 }
 0x167   :  { %v605_v47 = vpop.trf.xlu1 }
 0x168   :  { %v186_v48 = vpop.trf.xlu0  ;;  %1318 = vmatmul.mubr.msk.bf16.gmra.mrb[20].mxu0 %vm189_vm2, %v605_v47 }
 0x169   :  { %1280 = vmatmul.mubr.msk.bf16.gmra.mrb[8].mxu1 %vm189_vm2, %v186_v48 }
 0x16b   :  { %v606_v49 = vpop.trf.xlu1 }
 0x16c   :  { %v187_v50 = vpop.trf.xlu0  ;;  %1321 = vmatprep.mubr.msk.bf16.mxu0 %vm189_vm2, %v606_v49 }
 0x16d   :  { %1283 = vmatprep.mubr.msk.bf16.mxu1 %vm189_vm2, %v187_v50 }
 0x16f   :  { %v607_v51 = vpop.trf.xlu1 }
 0x170   :  { %v188_v52 = vpop.trf.xlu0  ;;  %1322 = vmatmul.mubr.msk.bf16.gmra.mrb[24].mxu0 %vm189_vm2, %v607_v51 }
 0x171   :  { %1284 = vmatmul.mubr.msk.bf16.gmra.mrb[12].mxu1 %vm189_vm2, %v188_v52 }
 0x22b   :  { %v1630_v53 = vpop.f32.mrb[12].mxu0 }
 0x22c   :  { %v1632_v54 = vpop.f32.mrb[0].mxu1  ;;  %v1634_v55 = vpop.f32.mrb[13].mxu0 }
 0x22d   :  { %319 = vmax.xlane.f32.xlu1 %v1632_v54  ;;  %v1637_v56 = vpop.f32.mrb[1].mxu1  ;;  %v1639_v57 = vpop.f32.mrb[14].mxu0 }
 0x22e   :  { %v1641_v58 = vpop.f32.mrb[2].mxu1  ;;  %v1643_v59 = vpop.f32.mrb[15].mxu0 }
 0x22f   :  { %v1645_v60 = vpop.f32.mrb[3].mxu1 }
 0x230   :  { %317 = vmax.xlane.f32.xlu0 %v1645_v60 }
 0x231   :  { %736 = vmax.xlane.f32.xlu1 %v1630_v53 }
 0x233   :  { %v1649_v61 = vpop.f32.mrb[16].mxu0 }
 0x234   :  { %v1651_v62 = vpop.f32.mrb[4].mxu1  ;;  %v1653_v63 = vpop.f32.mrb[17].mxu0 }
 0x235   :  { %315 = vmax.xlane.f32.xlu1 %v1637_v56  ;;  %327 = vmax.xlane.f32.xlu0 %v1651_v62  ;;  %v1657_v0 = vpop.f32.mrb[5].mxu1  ;;  %v1659_v1 = vpop.f32.mrb[18].mxu0 }
 0x236   :  { %v1661_v2 = vpop.f32.mrb[6].mxu1  ;;  %v1663_v3 = vpop.f32.mrb[19].mxu0 }
 0x237   :  { %v1665_v4 = vpop.f32.mrb[7].mxu1 }
 0x239   :  { %732 = vmax.xlane.f32.xlu1 %v1634_v55  ;;  %744 = vmax.xlane.f32.xlu0 %v1649_v61 }
 0x23b   :  { %v1669_v5 = vpop.f32.mrb[20].mxu0 }
 0x23c   :  { %v1671_v6 = vpop.f32.mrb[8].mxu1  ;;  %v1673_v8 = vpop.f32.mrb[21].mxu0 }
 0x23d   :  { %321 = vmax.xlane.f32.xlu1 %v1641_v58  ;;  %740 = vmax.xlane.f32.xlu0 %v1653_v63  ;;  %v1677_v9 = vpop.f32.mrb[9].mxu1  ;;  %v1679_v10 = vpop.f32.mrb[22].mxu0 }
 0x23e   :  { %v1681_v11 = vpop.f32.mrb[10].mxu1  ;;  %v1683_v12 = vpop.f32.mrb[23].mxu0 }
 0x23f   :  { %v1685_v13 = vpop.f32.mrb[11].mxu1 }
 0x241   :  { %738 = vmax.xlane.f32.xlu1 %v1639_v57  ;;  %335 = vmax.xlane.f32.xlu0 %v1671_v6 }
 0x243   :  { %v1689_v14 = vpop.f32.mrb[24].mxu0 }
 0x244   :  { %v1691_v15 = vpop.f32.mrb[12].mxu1  ;;  %v1693_v16 = vpop.f32.mrb[25].mxu0 }
 0x245   :  { %734 = vmax.xlane.f32.xlu1 %v1643_v59  ;;  %752 = vmax.xlane.f32.xlu0 %v1669_v5  ;;  %v1697_v17 = vpop.f32.mrb[13].mxu1  ;;  %v1699_v18 = vpop.f32.mrb[26].mxu0 }
 0x246   :  { %v1701_v19 = vpop.f32.mrb[14].mxu1  ;;  %v1703_v20 = vpop.f32.mrb[27].mxu0 }
 0x247   :  { %v1705_v21 = vpop.f32.mrb[15].mxu1 }
 0x249   :  { %323 = vmax.xlane.f32.xlu1 %v1657_v0  ;;  %331 = vmax.xlane.f32.xlu0 %v1677_v9 }
 0x24d   :  { %329 = vmax.xlane.f32.xlu1 %v1661_v2  ;;  %748 = vmax.xlane.f32.xlu0 %v1673_v8 }
 0x251   :  { %746 = vmax.xlane.f32.xlu1 %v1659_v1  ;;  %343 = vmax.xlane.f32.xlu0 %v1691_v15 }
 0x255   :  { %325 = vmax.xlane.f32.xlu1 %v1665_v4  ;;  %760 = vmax.xlane.f32.xlu0 %v1689_v14 }
 0x259   :  { %742 = vmax.xlane.f32.xlu1 %v1663_v3  ;;  %339 = vmax.xlane.f32.xlu0 %v1697_v17 }
 0x25d   :  { %337 = vmax.xlane.f32.xlu1 %v1681_v11  ;;  %756 = vmax.xlane.f32.xlu0 %v1693_v16 }
 0x261   :  { %754 = vmax.xlane.f32.xlu1 %v1679_v10 }
 0x265   :  { %333 = vmax.xlane.f32.xlu1 %v1685_v13 }
 0x269   :  { %750 = vmax.xlane.f32.xlu1 %v1683_v12 }
 0x26d   :  { %345 = vmax.xlane.f32.xlu1 %v1701_v19 }
 0x271   :  { %762 = vmax.xlane.f32.xlu1 %v1699_v18 }
 0x273   :  { %51 = vperm.xlu0 %1351, %v40_v24  }
 0x275   :  { %341 = vmax.xlane.f32.xlu1 %v1705_v21 }
 0x279   :  { %758 = vmax.xlane.f32.xlu1 %v1703_v20 }
 0x28a   :  { %56 = vperm.xlu1 %1352, %v41_v25  }
 0x2ba   :  { %v320_v26 = vpop.xlane.xlu1 %319 }
 0x2bb   :  { %v349_v27 = vsub.f32 %v1632_v54, %v320_v26 }
 0x2bd   :  { %v367_v28 = vmul.f32 1.442695, %v349_v27  ;;  %v318_v35 = vpop.xlane.xlu0 %317 }
 0x2be   :  { %v737_v36 = vpop.xlane.xlu1 %736  ;;  %v348_v25 = vsub.f32 %v1645_v60, %v318_v35 }
 0x2bf   :  { %1364 = vpow2.f32 %v367_v28  ;;  %v766_v37 = vsub.f32 %v1630_v53, %v737_v36 }
 0x2c0   :  { %v365_v36 = vmul.f32 1.442695, %v348_v25 }
 0x2c1   :  { %v784_v38 = vmul.f32 1.442695, %v766_v37 }
 0x2c2   :  { %v316_v39 = vpop.xlane.xlu1 %315  ;;  %v328_v40 = vpop.xlane.xlu0 %327 }
 0x2c3   :  { %1366 = vpow2.f32 %v784_v38  ;;  %v347_v41 = vsub.f32 %v1637_v56, %v316_v39  ;;  %v353_v43 = vsub.f32 %v1651_v62, %v328_v40 }
 0x2c5   :  { %v363_v42 = vmul.f32 1.442695, %v347_v41  ;;  %v375_v49 = vmul.f32 1.442695, %v353_v43 }
 0x2c6   :  { %v733_v44 = vpop.xlane.xlu1 %732  ;;  %v745_v45 = vpop.xlane.xlu0 %744 }
 0x2c7   :  { %1368 = vpow2.f32 %v363_v42  ;;  %v764_v46 = vsub.f32 %v1634_v55, %v733_v44  ;;  %v770_v50 = vsub.f32 %v1649_v61, %v745_v45 }
 0x2c9   :  { %v1737_v47 = vpop.eup %1364  ;;  %v780_v48 = vmul.f32 1.442695, %v764_v46  ;;  %v792_v62 = vmul.f32 1.442695, %v770_v50 }
 0x2ca   :  { %v322_v51 = vpop.xlane.xlu1 %321  ;;  %v741_v52 = vpop.xlane.xlu0 %740  ;;  %399 = vadd.xlane.f32.xlu0 %v1737_v47 }
 0x2cb   :  { %1370 = vpow2.f32 %v780_v48  ;;  %v350_v53 = vsub.f32 %v1641_v58, %v322_v51  ;;  %v768_v39 = vsub.f32 %v1653_v63, %v741_v52 }
 0x2cc   :  { %1372 = vpow2.f32 %v375_v49 }
 0x2cd   :  { %v1742_v54 = vpop.eup %1366  ;;  %v369_v56 = vmul.f32 1.442695, %v350_v53  ;;  %v788_v44 = vmul.f32 1.442695, %v768_v39 }
 0x2ce   :  { %v739_v24 = vpop.xlane.xlu1 %738  ;;  %v336_v55 = vpop.xlane.xlu0 %335  ;;  %816 = vadd.xlane.f32.xlu0 %v1742_v54 }
 0x2cf   :  { %1374 = vpow2.f32 %v369_v56  ;;  %v767_v61 = vsub.f32 %v1639_v57, %v739_v24 }
 0x2d0   :  { %1376 = vpow2.f32 %v792_v62 }
 0x2d1   :  { %v1747_v26 = vpop.eup %1368  ;;  %v786_v27 = vmul.f32 1.442695, %v767_v61 }
 0x2d2   :  { %v735_v28 = vpop.xlane.xlu1 %734  ;;  %v753_v58 = vpop.xlane.xlu0 %752  ;;  %395 = vadd.xlane.f32.xlu0 %v1747_v26 }
 0x2d3   :  { %1378 = vpow2.f32 %v786_v27  ;;  %v765_v37 = vsub.f32 %v1643_v59, %v735_v28  ;;  %v357_v59 = vsub.f32 %v1671_v6, %v336_v55  ;;  %v774_v51 = vsub.f32 %v1669_v5, %v753_v58 }
 0x2d4   :  { %1380 = vpow2.f32 %v365_v36 }
 0x2d5   :  { %v1751_v38 = vpop.eup %1370  ;;  %v782_v60 = vmul.f32 1.442695, %v765_v37  ;;  %v383_v50 = vmul.f32 1.442695, %v357_v59  ;;  %v800_v62 = vmul.f32 1.442695, %v774_v51 }
 0x2d6   :  { %v324_v35 = vpop.xlane.xlu1 %323  ;;  %v332_v40 = vpop.xlane.xlu0 %331  ;;  %812 = vadd.xlane.f32.xlu0 %v1751_v38 }
 0x2d7   :  { %v351_v57 = vsub.f32 %v1657_v0, %v324_v35  ;;  %v1756_v41 = vpop.eup %1372  ;;  %1382 = vpow2.f32 %v782_v60  ;;  %v355_v24 = vsub.f32 %v1677_v9, %v332_v40 }
 0x2d9   :  { %v1758_v42 = vpop.eup %1374  ;;  %v371_v43 = vmul.f32 1.442695, %v351_v57 }
 0x2da   :  { %v330_v45 = vpop.xlane.xlu1 %329  ;;  %407 = vadd.xlane.f32.xlu0 %v1756_v41  ;;  %401 = vadd.xlane.f32.xlu1 %v1758_v42  ;;  %v749_v46 = vpop.xlane.xlu0 %748 }
 0x2db   :  { %1384 = vpow2.f32 %v371_v43  ;;  %v354_v63 = vsub.f32 %v1661_v2, %v330_v45  ;;  %v1764_v48 = vpop.eup %1376  ;;  %v772_v28 = vsub.f32 %v1673_v8, %v749_v46 }
 0x2dc   :  { %1386 = vpow2.f32 %v788_v44 }
 0x2dd   :  { %v1766_v0 = vpop.eup %1378  ;;  %v377_v49 = vmul.f32 1.442695, %v354_v63  ;;  %v796_v60 = vmul.f32 1.442695, %v772_v28 }
 0x2de   :  { %v747_v6 = vpop.xlane.xlu1 %746  ;;  %824 = vadd.xlane.f32.xlu0 %v1764_v48  ;;  %818 = vadd.xlane.f32.xlu1 %v1766_v0  ;;  %v1772_v53 = vpop.eup %1380 }
 0x2df   :  { %1388 = vpow2.f32 %v377_v49  ;;  %v771_v52 = vsub.f32 %v1659_v1, %v747_v6  ;;  %v344_v56 = vpop.xlane.xlu0 %343  ;;  %v379_v1 = vmul.f32 1.442695, %v355_v24 }
 0x2e0   :  { %1390 = vpow2.f32 %v383_v50  ;;  %v361_v35 = vsub.f32 %v1691_v15, %v344_v56 }
 0x2e1   :  { %v794_v2 = vmul.f32 1.442695, %v771_v52  ;;  %v1777_v25 = vpop.eup %1382 }
 0x2e2   :  { %v326_v55 = vpop.xlane.xlu1 %325  ;;  %397 = vadd.xlane.f32.xlu1 %v1772_v53  ;;  %v391_v59 = vmul.f32 1.442695, %v361_v35 }
 0x2e3   :  { %1392 = vpow2.f32 %v794_v2  ;;  %v352_v5 = vsub.f32 %v1665_v4, %v326_v55  ;;  %v761_v9 = vpop.xlane.xlu0 %760 }
 0x2e4   :  { %1394 = vpow2.f32 %v800_v62  ;;  %v778_v45 = vsub.f32 %v1689_v14, %v761_v9 }
 0x2e5   :  { %v1779_v61 = vpop.eup %1384  ;;  %v373_v27 = vmul.f32 1.442695, %v352_v5 }
 0x2e6   :  { %v743_v58 = vpop.xlane.xlu1 %742  ;;  %403 = vadd.xlane.f32.xlu0 %v1779_v61  ;;  %814 = vadd.xlane.f32.xlu1 %v1777_v25  ;;  %v1785_v37 = vpop.eup %1386  ;;  %v808_v50 = vmul.f32 1.442695, %v778_v45 }
 0x2e7   :  { %1396 = vpow2.f32 %v373_v27  ;;  %v769_v36 = vsub.f32 %v1663_v3, %v743_v58  ;;  %v340_v43 = vpop.xlane.xlu0 %339 }
 0x2e8   :  { %1398 = vpow2.f32 %v379_v1  ;;  %v359_v51 = vsub.f32 %v1697_v17, %v340_v43 }
 0x2e9   :  { %v1787_v4 = vpop.eup %1388  ;;  %v790_v39 = vmul.f32 1.442695, %v769_v36 }
 0x2ea   :  { %v338_v40 = vpop.xlane.xlu1 %337  ;;  %820 = vadd.xlane.f32.xlu0 %v1785_v37  ;;  %409 = vadd.xlane.f32.xlu1 %v1787_v4  ;;  %v1793_v57 = vpop.eup %1390  ;;  %v387_v62 = vmul.f32 1.442695, %v359_v51 }
 0x2eb   :  { %1400 = vpow2.f32 %v790_v39  ;;  %v358_v8 = vsub.f32 %v1681_v11, %v338_v40  ;;  %v757_v14 = vpop.xlane.xlu0 %756 }
 0x2ec   :  { %1402 = vpow2.f32 %v796_v60  ;;  %v776_v24 = vsub.f32 %v1693_v16, %v757_v14 }
 0x2ed   :  { %v1795_v3 = vpop.eup %1392  ;;  %v385_v44 = vmul.f32 1.442695, %v358_v8 }
 0x2ee   :  { %v755_v63 = vpop.xlane.xlu1 %754  ;;  %415 = vadd.xlane.f32.xlu0 %v1793_v57  ;;  %826 = vadd.xlane.f32.xlu1 %v1795_v3  ;;  %v1801_v46 = vpop.eup %1394  ;;  %v804_v1 = vmul.f32 1.442695, %v776_v24 }
 0x2ef   :  { %1404 = vpow2.f32 %v385_v44  ;;  %v775_v15 = vsub.f32 %v1679_v10, %v755_v63 }
 0x2f0   :  { %1406 = vpow2.f32 %v391_v59 }
 0x2f1   :  { %v1803_v11 = vpop.eup %1396  ;;  %v802_v49 = vmul.f32 1.442695, %v775_v15 }
 0x2f2   :  { %v334_v6 = vpop.xlane.xlu1 %333  ;;  %832 = vadd.xlane.f32.xlu0 %v1801_v46  ;;  %405 = vadd.xlane.f32.xlu1 %v1803_v11  ;;  %v1809_v2 = vpop.eup %1398 }
 0x2f3   :  { %1408 = vpow2.f32 %v802_v49  ;;  %v356_v52 = vsub.f32 %v1685_v13, %v334_v6  ;;  %v52_v45 = vpop.permute.xlu0 %51 }
 0x2f4   :  { %1410 = vpow2.f32 %v808_v50  ;;  %v133_v6 = vadd.f32 %v1599_v23, %v52_v45  ;;  %v43_v23 = vld [vmem:[%s1975_s2 + $0x20] sm:$0xff] }
 0x2f5   :  { %v1811_v10 = vpop.eup %1400  ;;  %v381_v56 = vmul.f32 1.442695, %v356_v52 }
 0x2f6   :  { %v751_v55 = vpop.xlane.xlu1 %750  ;;  %411 = vadd.xlane.f32.xlu0 %v1809_v2  ;;  %822 = vadd.xlane.f32.xlu1 %v1811_v10  ;;  %v1817_v5 = vpop.eup %1402 }
 0x2f7   :  { %1412 = vpow2.f32 %v381_v56  ;;  %v773_v17 = vsub.f32 %v1683_v12, %v751_v55  ;;  %v1017_v55 = vld [vmem:[%s1977_s4 + $0x18] sm:$0xff] }
 0x2f8   :  { %1414 = vpow2.f32 %v387_v62 }
 0x2f9   :  { %v1819_v13 = vpop.eup %1404  ;;  %v798_v27 = vmul.f32 1.442695, %v773_v17  ;;  %v1014_v17 = vld [vmem:[%s1977_s4] sm:$0xff] }
 0x2fa   :  { %828 = vadd.xlane.f32.xlu0 %v1817_v5  ;;  %v346_v28 = vpop.xlane.xlu1 %345  ;;  %417 = vadd.xlane.f32.xlu1 %v1819_v13  ;;  %v1824_v58 = vpop.eup %1406 }
 0x2fb   :  { %1416 = vpow2.f32 %v798_v27  ;;  %v362_v16 = vsub.f32 %v1701_v19, %v346_v28  ;;  %v1016_v27 = vld [vmem:[%s1977_s4 + $0x10] sm:$0xff] }
 0x2fc   :  { %1418 = vpow2.f32 %v804_v1 }
 0x2fd   :  { %v1826_v9 = vpop.eup %1408  ;;  %v393_v12 = vmul.f32 1.442695, %v362_v16 }
 0x2fe   :  { %423 = vadd.xlane.f32.xlu0 %v1824_v58  ;;  %v763_v36 = vpop.xlane.xlu1 %762  ;;  %834 = vadd.xlane.f32.xlu1 %v1826_v9  ;;  %v1831_v60 = vpop.eup %1410 }
 0x2ff   :  { %1420 = vpow2.f32 %v393_v12  ;;  %v779_v39 = vsub.f32 %v1699_v18, %v763_v36 }
 0x301   :  { %v1833_v35 = vpop.eup %1412  ;;  %v810_v40 = vmul.f32 1.442695, %v779_v39 }
 0x302   :  { %840 = vadd.xlane.f32.xlu0 %v1831_v60  ;;  %413 = vadd.xlane.f32.xlu1 %v1833_v35  ;;  %v342_v19 = vpop.xlane.xlu1 %341  ;;  %v1838_v43 = vpop.eup %1414 }
 0x303   :  { %1422 = vpow2.f32 %v810_v40  ;;  %v360_v8 = vsub.f32 %v1705_v21, %v342_v19  ;;  %v131_v21 = vadd.f32 %v1597_v22, %v52_v45 }
 0x305   :  { %v1840_v44 = vpop.eup %1416  ;;  %v389_v59 = vmul.f32 1.442695, %v360_v8 }
 0x306   :  { %419 = vadd.xlane.f32.xlu0 %v1838_v43  ;;  %830 = vadd.xlane.f32.xlu1 %v1840_v44  ;;  %v759_v18 = vpop.xlane.xlu1 %758  ;;  %v1845_v15 = vpop.eup %1418 }
 0x307   :  { %1424 = vpow2.f32 %v389_v59  ;;  %v777_v63 = vsub.f32 %v1703_v20, %v759_v18 }
 0x309   :  { %v1847_v49 = vpop.eup %1420  ;;  %v806_v50 = vmul.f32 1.442695, %v777_v63 }
 0x30a   :  { %836 = vadd.xlane.f32.xlu0 %v1845_v15  ;;  %425 = vadd.xlane.f32.xlu1 %v1847_v49  ;;  %v57_v51 = vpop.permute.xlu1 %56 }
 0x30b   :  { %1426 = vpow2.f32 %v806_v50  ;;  %v137_v14 = vadd.f32 %v1602_v29, %v57_v51  ;;  %v139_v52 = vadd.f32 %v1604_v30, %v57_v51  ;;  %v1015_v29 = vld [vmem:[%s1977_s4 + $0x8] sm:$0xff]  ;;  %v42_v30 = vld [vmem:[%s1975_s2 + $0x18] sm:$0xff] }
 0x30d   :  { %v1855_v20 = vpop.eup %1422  ;;  %v162_v56 = vpack.c.bf16 %v137_v14, %v131_v21  ;;  %v163_v62 = vpack.c.bf16 %v139_v52, %v133_v6 }
 0x30e   :  { %842 = vadd.xlane.f32.xlu1 %v1855_v20 }
 0x30f   :  { %1303 = vmatprep.mubr.bf16.mxu1 %v162_v56  ;;  %1341 = vmatprep.mubr.bf16.mxu0 %v163_v62 }
 0x311   :  { %v1858_v22 = vpop.eup %1424 }
 0x312   :  { %421 = vadd.xlane.f32.xlu1 %v1858_v22 }
 0x315   :  { %v1861_v24 = vpop.eup %1426 }
 0x316   :  { %838 = vadd.xlane.f32.xlu1 %v1861_v24 }
 0x320   :  { %66 = vperm.xlu0 %1351, %v43_v23  }
 0x324   :  { %1025 = vperm.xlu0 %1351, %v1015_v29  }
 0x327   :  { %61 = vperm.xlu1 %1352, %v42_v30  }
 0x328   :  { %1035 = vperm.xlu0 %1351, %v1017_v55  }
 0x32b   :  { %1020 = vperm.xlu1 %1352, %v1014_v17  }
 0x32f   :  { %1030 = vperm.xlu1 %1352, %v1016_v27  }
 0x357   :  { %v400_v1 = vpop.xlane.xlu0 %399 }
 0x35b   :  { %v817_v28 = vpop.xlane.xlu0 %816 }
 0x35f   :  { %v396_v16 = vpop.xlane.xlu0 %395 }
 0x363   :  { %v813_v12 = vpop.xlane.xlu0 %812 }
 0x367   :  { %v402_v36 = vpop.xlane.xlu1 %401  ;;  %v408_v39 = vpop.xlane.xlu0 %407 }
 0x368   :  { %1428 = vrcp.f32 %v402_v36 }
 0x369   :  { %1430 = vrcp.f32 %v400_v1 }
 0x36a   :  { %1432 = vrcp.f32 %v396_v16 }
 0x36b   :  { %v819_v40 = vpop.xlane.xlu1 %818  ;;  %v825_v19 = vpop.xlane.xlu0 %824 }
 0x36f   :  { %v398_v8 = vpop.xlane.xlu1 %397 }
 0x370   :  { %1434 = vrcp.f32 %v398_v8 }
 0x371   :  { %1436 = vrcp.f32 %v819_v40 }
 0x372   :  { %1438 = vrcp.f32 %v817_v28  ;;  %v1429_v45 = vpop.eup %1428 }
 0x373   :  { %1440 = vrcp.f32 %v813_v12  ;;  %v404_v59 = vpop.xlane.xlu0 %403  ;;  %v815_v18 = vpop.xlane.xlu1 %814  ;;  %v446_v6 = vmul.f32 %v1429_v45, %v1758_v42 }
 0x374   :  { %1442 = vrcp.f32 %v815_v18  ;;  %v1431_v63 = vpop.eup %1430 }
 0x375   :  { %v1433_v51 = vpop.eup %1432  ;;  %v445_v30 = vmul.f32 %v1431_v63, %v1737_v47 }
 0x376   :  { %v443_v23 = vmul.f32 %v1433_v51, %v1747_v26 }
 0x377   :  { %v821_v50 = vpop.xlane.xlu0 %820  ;;  %v410_v21 = vpop.xlane.xlu1 %409  ;;  %v460_v1 = vpack.c.bf16 %v446_v6, %v445_v30 }
 0x378   :  { %1444 = vrcp.f32 %v410_v21 }
 0x379   :  { %1446 = vrcp.f32 %v404_v59  ;;  %v469_v18 = vunpack.c.l.bf16 %v460_v1  ;;  %v470_v45 = vunpack.c.h.bf16 %v460_v1 }
 0x37a   :  { %v1435_v14 = vpop.eup %1434  ;;  %1448 = vrcp.f32 %v408_v39 }
 0x37b   :  { %v1437_v52 = vpop.eup %1436  ;;  %v416_v56 = vpop.xlane.xlu0 %415  ;;  %v444_v29 = vmul.f32 %v1435_v14, %v1772_v53 }
 0x37c   :  { %v827_v62 = vpop.xlane.xlu1 %826  ;;  %v1439_v55 = vpop.eup %1438  ;;  %v863_v28 = vmul.f32 %v1437_v52, %v1766_v0 }
 0x37d   :  { %v1441_v17 = vpop.eup %1440  ;;  %v459_v27 = vpack.c.bf16 %v444_v29, %v443_v23  ;;  %v862_v53 = vmul.f32 %v1439_v55, %v1742_v54 }
 0x37e   :  { %v1443_v16 = vpop.eup %1442  ;;  %v860_v26 = vmul.f32 %v1441_v17, %v1751_v38 }
 0x37f   :  { %v1887_v42 = vpop.xlane.xlu0 %832  ;;  %v467_v12 = vunpack.c.l.bf16 %v459_v27  ;;  %v468_v36 = vunpack.c.h.bf16 %v459_v27  ;;  %1287 = vmatprep.subr.bf16.mxu1 %v459_v27  ;;  %v861_v47 = vmul.f32 %v1443_v16, %v1777_v25  ;;  %v877_v59 = vpack.c.bf16 %v863_v28, %v862_v53 }
 0x380   :  { %v406_v40 = vpop.xlane.xlu1 %405  ;;  %1288 = vmatpush3.bf16.msra.mxu1 %v459_v27 }
 0x381   :  { %v483_v8 = vadd.f32 %v468_v36, %v467_v12  ;;  %1450 = vrcp.f32 %v406_v40  ;;  %1289 = vmatprep.subr.bf16.mxu1 %v460_v1  ;;  %v876_v0 = vpack.c.bf16 %v861_v47, %v860_v26  ;;  %v886_v25 = vunpack.c.l.bf16 %v877_v59 }
 0x382   :  { %1452 = vrcp.f32 %v821_v50  ;;  %v1445_v52 = vpop.eup %1444  ;;  %v887_v23 = vunpack.c.h.bf16 %v877_v59 }
 0x383   :  { %1454 = vrcp.f32 %v827_v62  ;;  %v484_v63 = vadd.f32 %v483_v8, %v469_v18  ;;  %v412_v21 = vpop.xlane.xlu0 %411  ;;  %v884_v39 = vunpack.c.l.bf16 %v876_v0  ;;  %v885_v6 = vunpack.c.h.bf16 %v876_v0  ;;  %1325 = vmatprep.subr.bf16.mxu0 %v876_v0  ;;  %v1447_v29 = vpop.eup %1446 }
 0x384   :  { %v823_v51 = vpop.xlane.xlu1 %822  ;;  %1456 = vrcp.f32 %v825_v19  ;;  %1290 = vmatpush3.bf16.msra.mxu1 %v460_v1  ;;  %1326 = vmatpush3.bf16.msra.mxu0 %v876_v0  ;;  %v1449_v30 = vpop.eup %1448  ;;  %v450_v1 = vmul.f32 %v1445_v52, %v1787_v4  ;;  %v447_v16 = vmul.f32 %v1447_v29, %v1779_v61 }
 0x385   :  { %v485_v38 = vadd.f32 %v484_v63, %v470_v45  ;;  %1458 = vrcp.f32 %v823_v51  ;;  %v900_v54 = vadd.f32 %v885_v6, %v884_v39  ;;  %1327 = vmatprep.subr.bf16.mxu0 %v877_v59  ;;  %v449_v40 = vmul.f32 %v1449_v30, %v1756_v41 }
 0x386   :  { %1460 = vrcp.f32 %v416_v56 }
 0x387   :  { %v829_v14 = vpop.xlane.xlu0 %828  ;;  %v901_v62 = vadd.f32 %v900_v54, %v886_v25  ;;  %1462 = vrcp.f32 %v412_v21  ;;  %v462_v18 = vpack.c.bf16 %v450_v1, %v449_v40 }
 0x388   :  { %v418_v50 = vpop.xlane.xlu1 %417  ;;  %1328 = vmatpush3.bf16.msra.mxu0 %v877_v59 }
 0x389   :  { %v902_v55 = vadd.f32 %v901_v62, %v887_v23  ;;  %1464 = vrcp.f32 %v418_v50  ;;  %v473_v21 = vunpack.c.l.bf16 %v462_v18  ;;  %v474_v39 = vunpack.c.h.bf16 %v462_v18 }
 0x38b   :  { %v1451_v19 = vpop.eup %1450  ;;  %v1892_v17 = vpop.xlane.xlu0 %423 }
 0x38c   :  { %v835_v27 = vpop.xlane.xlu1 %834  ;;  %v1453_v28 = vpop.eup %1452  ;;  %v448_v12 = vmul.f32 %v1451_v19, %v1803_v11 }
 0x38d   :  { %v1455_v36 = vpop.eup %1454  ;;  %v864_v4 = vmul.f32 %v1453_v28, %v1785_v37 }
 0x38e   :  { %v1457_v26 = vpop.eup %1456  ;;  %v461_v47 = vpack.c.bf16 %v448_v12, %v447_v16  ;;  %v867_v61 = vmul.f32 %v1455_v36, %v1795_v3 }
 0x38f   :  { %v1459_v53 = vpop.eup %1458  ;;  %v1901_v11 = vpop.xlane.xlu0 %840  ;;  %v866_v41 = vmul.f32 %v1457_v26, %v1764_v48 }
 0x390   :  { %v414_v8 = vpop.xlane.xlu1 %413  ;;  %v471_v0 = vunpack.c.l.bf16 %v461_v47  ;;  %1291 = vmatprep.subr.bf16.mxu1 %v461_v47  ;;  %v865_v59 = vmul.f32 %v1459_v53, %v1811_v10  ;;  %v472_v56 = vunpack.c.h.bf16 %v461_v47 }
 0x391   :  { %1466 = vrcp.f32 %v414_v8  ;;  %1292 = vmatpush3.bf16.msra.mxu1 %v461_v47  ;;  %v879_v3 = vpack.c.bf16 %v867_v61, %v866_v41 }
 0x392   :  { %1468 = vrcp.f32 %v1887_v42  ;;  %v486_v45 = vadd.f32 %v485_v38, %v471_v0  ;;  %1293 = vmatprep.subr.bf16.mxu1 %v462_v18  ;;  %v878_v63 = vpack.c.bf16 %v865_v59, %v864_v4  ;;  %v1461_v42 = vpop.eup %1460 }
 0x393   :  { %1470 = vrcp.f32 %v829_v14  ;;  %v420_v38 = vpop.xlane.xlu0 %419  ;;  %v1463_v50 = vpop.eup %1462  ;;  %v890_v23 = vunpack.c.l.bf16 %v879_v3  ;;  %v891_v29 = vunpack.c.h.bf16 %v879_v3  ;;  %v453_v53 = vmul.f32 %v1461_v42, %v1793_v57 }
 0x394   :  { %v831_v51 = vpop.xlane.xlu1 %830  ;;  %1472 = vrcp.f32 %v835_v27  ;;  %v487_v37 = vadd.f32 %v486_v45, %v472_v56  ;;  %v888_v10 = vunpack.c.l.bf16 %v878_v63  ;;  %1329 = vmatprep.subr.bf16.mxu0 %v878_v63  ;;  %v889_v48 = vunpack.c.h.bf16 %v878_v63  ;;  %v1465_v62 = vpop.eup %1464 }
 0x395   :  { %1474 = vrcp.f32 %v831_v51  ;;  %1294 = vmatpush3.bf16.msra.mxu1 %v462_v18  ;;  %1330 = vmatpush3.bf16.msra.mxu0 %v878_v63  ;;  %v451_v16 = vmul.f32 %v1463_v50, %v1809_v2  ;;  %v454_v12 = vmul.f32 %v1465_v62, %v1819_v13 }
 0x396   :  { %v488_v6 = vadd.f32 %v487_v37, %v473_v21  ;;  %v903_v54 = vadd.f32 %v902_v55, %v888_v10  ;;  %1331 = vmatprep.subr.bf16.mxu0 %v879_v3  ;;  %1476 = vrcp.f32 %v1892_v17 }
 0x397   :  { %v837_v40 = vpop.xlane.xlu0 %836  ;;  %1478 = vrcp.f32 %v420_v38  ;;  %v464_v2 = vpack.c.bf16 %v454_v12, %v453_v53 }
 0x398   :  { %v426_v25 = vpop.xlane.xlu1 %425  ;;  %v489_v14 = vadd.f32 %v488_v6, %v474_v39  ;;  %v904_v52 = vadd.f32 %v903_v54, %v889_v48 }
 0x399   :  { %1332 = vmatpush3.bf16.msra.mxu0 %v879_v3  ;;  %1480 = vrcp.f32 %v426_v25  ;;  %v477_v63 = vunpack.c.l.bf16 %v464_v2 }
 0x39a   :  { %v905_v30 = vadd.f32 %v904_v52, %v890_v23  ;;  %1482 = vrcp.f32 %v837_v40 }
 0x39b   :  { %v1467_v19 = vpop.eup %1466 }
 0x39c   :  { %v843_v27 = vpop.xlane.xlu1 %842  ;;  %v1469_v1 = vpop.eup %1468  ;;  %v906_v28 = vadd.f32 %v905_v30, %v891_v29  ;;  %v452_v55 = vmul.f32 %v1467_v19, %v1833_v35 }
 0x39d   :  { %v1471_v36 = vpop.eup %1470  ;;  %v870_v41 = vmul.f32 %v1469_v1, %v1801_v46 }
 0x39e   :  { %v1473_v26 = vpop.eup %1472  ;;  %v463_v47 = vpack.c.bf16 %v452_v55, %v451_v16  ;;  %v868_v13 = vmul.f32 %v1471_v36, %v1817_v5 }
 0x39f   :  { %v1475_v8 = vpop.eup %1474  ;;  %v871_v17 = vmul.f32 %v1473_v26, %v1826_v9  ;;  %v67_v56 = vpop.permute.xlu0 %66 }
 0x3a0   :  { %v422_v18 = vpop.xlane.xlu1 %421  ;;  %v475_v0 = vunpack.c.l.bf16 %v463_v47  ;;  %1295 = vmatprep.subr.bf16.mxu1 %v463_v47  ;;  %v869_v35 = vmul.f32 %v1475_v8, %v1840_v44  ;;  %v476_v4 = vunpack.c.h.bf16 %v463_v47  ;;  %v478_v44 = vunpack.c.h.bf16 %v464_v2  ;;  %v1477_v51 = vpop.eup %1476 }
 0x3a1   :  { %1484 = vrcp.f32 %v422_v18  ;;  %1296 = vmatpush3.bf16.msra.mxu1 %v463_v47  ;;  %v881_v5 = vpack.c.bf16 %v871_v17, %v870_v41  ;;  %v147_v37 = vadd.f32 %v1610_v33, %v67_v56  ;;  %v1479_v39 = vpop.eup %1478  ;;  %v149_v46 = vadd.f32 %v1612_v34, %v67_v56 }
 0x3a2   :  { %1486 = vrcp.f32 %v843_v27  ;;  %v490_v59 = vadd.f32 %v489_v14, %v475_v0  ;;  %1297 = vmatprep.subr.bf16.mxu1 %v464_v2  ;;  %v880_v57 = vpack.c.bf16 %v869_v35, %v868_v13  ;;  %v455_v30 = vmul.f32 %v1479_v39, %v1838_v43 }
 0x3a3   :  { %1488 = vrcp.f32 %v1901_v11  ;;  %v1481_v42 = vpop.eup %1480  ;;  %v894_v25 = vunpack.c.l.bf16 %v881_v5  ;;  %v895_v23 = vunpack.c.h.bf16 %v881_v5 }
 0x3a4   :  { %v839_v61 = vpop.xlane.xlu1 %838  ;;  %v491_v45 = vadd.f32 %v490_v59, %v476_v4  ;;  %v892_v21 = vunpack.c.l.bf16 %v880_v57  ;;  %1333 = vmatprep.subr.bf16.mxu0 %v880_v57  ;;  %v893_v10 = vunpack.c.h.bf16 %v880_v57  ;;  %v1483_v50 = vpop.eup %1482  ;;  %v458_v19 = vmul.f32 %v1481_v42, %v1847_v49  ;;  %v562_v42 = vld [vmem:[%s1973_s0 + $0x30] sm:$0xff] }
 0x3a5   :  { %1490 = vrcp.f32 %v839_v61  ;;  %1298 = vmatpush3.bf16.msra.mxu1 %v464_v2  ;;  %1334 = vmatpush3.bf16.msra.mxu0 %v880_v57  ;;  %v872_v16 = vmul.f32 %v1483_v50, %v1845_v15 }
 0x3a6   :  { %v492_v9 = vadd.f32 %v491_v45, %v477_v63  ;;  %v907_v11 = vadd.f32 %v906_v28, %v892_v21  ;;  %1335 = vmatprep.subr.bf16.mxu0 %v881_v5  ;;  %v457_v28 = vmul.f32 %v1477_v51, %v1824_v58 }
 0x3a8   :  { %v62_v3 = vpop.permute.xlu1 %61  ;;  %v493_v6 = vadd.f32 %v492_v9, %v478_v44  ;;  %v908_v38 = vadd.f32 %v907_v11, %v893_v10  ;;  %v466_v40 = vpack.c.bf16 %v458_v19, %v457_v28  ;;  %v1198_v19 = vld [vmem:[%s1973_s0 + $0x8] sm:$0xff]  ;;  %v1201_v28 = vld [vmem:[%s1973_s0 + $0x38] sm:$0xff] }
 0x3a9   :  { %v141_v48 = vadd.f32 %v1606_v31, %v62_v3  ;;  %v143_v54 = vadd.f32 %v1608_v32, %v62_v3  ;;  %1336 = vmatpush3.bf16.msra.mxu0 %v881_v5  ;;  %v561_v3 = vld [vmem:[%s1973_s0 + $0x20] sm:$0xff] }
 0x3aa   :  { %v909_v62 = vadd.f32 %v908_v38, %v894_v25  ;;  %v481_v8 = vunpack.c.l.bf16 %v466_v40 }
 0x3ab   :  { %v164_v14 = vpack.c.bf16 %v147_v37, %v141_v48  ;;  %v165_v52 = vpack.c.bf16 %v149_v46, %v143_v54  ;;  %v1485_v33 = vpop.eup %1484 }
 0x3ac   :  { %v1487_v29 = vpop.eup %1486  ;;  %v456_v34 = vmul.f32 %v1485_v33, %v1858_v22  ;;  %v910_v27 = vadd.f32 %v909_v62, %v895_v23  ;;  %v1200_v23 = vld [vmem:[%s1973_s0 + $0x28] sm:$0xff] }
 0x3ad   :  { %v1489_v31 = vpop.eup %1488  ;;  %v875_v12 = vmul.f32 %v1487_v29, %v1855_v20  ;;  %v482_v20 = vunpack.c.h.bf16 %v466_v40 }
 0x3ae   :  { %v465_v1 = vpack.c.bf16 %v456_v34, %v455_v30  ;;  %v874_v22 = vmul.f32 %v1489_v31, %v1831_v60 }
 0x3af   :  { %v1491_v32 = vpop.eup %1490 }
 0x3b0   :  { %v873_v55 = vmul.f32 %v1491_v32, %v1861_v24  ;;  %v479_v36 = vunpack.c.l.bf16 %v465_v1  ;;  %1299 = vmatprep.subr.bf16.mxu1 %v465_v1  ;;  %v480_v49 = vunpack.c.h.bf16 %v465_v1  ;;  %v883_v53 = vpack.c.bf16 %v875_v12, %v874_v22 }
 0x3b1   :  { %1300 = vmatpush3.bf16.msra.mxu1 %v465_v1 }
 0x3b2   :  { %v882_v43 = vpack.c.bf16 %v873_v55, %v872_v16  ;;  %v494_v26 = vadd.f32 %v493_v6, %v479_v36  ;;  %1301 = vmatprep.subr.bf16.mxu1 %v466_v40  ;;  %v898_v2 = vunpack.c.l.bf16 %v883_v53  ;;  %v899_v60 = vunpack.c.h.bf16 %v883_v53  ;;  %v559_v6 = vld [vmem:[%s1973_s0] sm:$0xff] }
 0x3b4   :  { %v896_v47 = vunpack.c.l.bf16 %v882_v43  ;;  %1337 = vmatprep.subr.bf16.mxu0 %v882_v43  ;;  %v495_v58 = vadd.f32 %v494_v26, %v480_v49  ;;  %v897_v15 = vunpack.c.h.bf16 %v882_v43 }
 0x3b5   :  { %1338 = vmatpush3.bf16.msra.mxu0 %v882_v43  ;;  %1302 = vmatpush3.bf16.msra.mxu1 %v466_v40  ;;  %v1199_v43 = vld [vmem:[%s1973_s0 + $0x18] sm:$0xff] }
 0x3b6   :  { %v911_v24 = vadd.f32 %v910_v27, %v896_v47  ;;  %1339 = vmatprep.subr.bf16.mxu0 %v883_v53  ;;  %v496_v18 = vadd.f32 %v495_v58, %v481_v8 }
 0x3b8   :  { %v912_v0 = vadd.f32 %v911_v24, %v897_v15  ;;  %v497_v13 = vadd.f32 %v496_v18, %v482_v20  ;;  %1304 = vmatmul.mubr.bf16.vlgmr.msra.gmra.mrb[16].mxu1 %v164_v14 }
 0x3b9   :  { %1340 = vmatpush3.bf16.msra.mxu0 %v883_v53  ;;  %1106 = vmatprep.mubr.bf16.mxu1 %v1520_v7 }
 0x3ba   :  { %v913_v35 = vadd.f32 %v912_v0, %v898_v2  ;;  %v498_v4 = vrot.slane %v497_v13, 4 }
 0x3bc   :  { %v914_v17 = vadd.f32 %v913_v35, %v899_v60  ;;  %1342 = vmatmul.mubr.bf16.vlgmr.msra.gmra.mrb[28].mxu0 %v165_v52  ;;  %v499_v57 = vadd.f32 %v498_v4, %v497_v13  ;;  %v560_v52 = vld [vmem:[%s1973_s0 + $0x10] sm:$0xff]  ;;  %v1362_v60 = vld [vmem:[%s1976_s3] sm:$0xff]   ;;  %v1363_v35 = vld [vmem:[%s1976_s3 + $0x8] sm:$0xff]   ;;  %s1521_s3 = smov [#allocation4]  }
 0x3bd   :  { %s1160_s23 = sshll.u32 %s1521_s3, 4  ;;  %s1161_s23 = int_to_ptr.vmem [resolvable:$true] %s1160_s23 }
 0x3be   :  { %v915_v59 = vrot.slane %v914_v17, 4  ;;  %v500_v41 = vrot.slane %v499_v57, 2  ;;  %s1496_s24 = scalar_lea.vmem %s1161_s23, 512  ;;  %p1501_p1 = scmp.lt.s32.totalorder %s1161_s23, %s1161_s23 }
 0x3bf   :  { %p1497_p0 = scmp.ne.s32.totalorder %s1161_s23, %s1496_s24  ;;  %p1502_p2 = scmp.lt.s32.totalorder %s1496_s24, %s1496_s24 }
 0x3c0   :  { %v916_v61 = vadd.f32 %v915_v59, %v914_v17  ;;  %v501_v45 = vadd.f32 %v500_v41, %v499_v57  ;;  %v1021_v17 = vpop.permute.xlu1 %1020 }
 0x3c1   :  { %p1503_p3 = por %p1502_p2, %p1501_p1 }
 0x3c2   :  { %v917_v56 = vrot.slane %v916_v61, 2  ;;  %v502_v21 = vrot.slane %v501_v45, 1 }
 0x3c3   :  { %p1504_p4 = pnand %p1503_p3, %p1497_p0 }
 0x3c4   :  { %v918_v63 = vadd.f32 %v917_v56, %v916_v61  ;;  %v503_v44 = vadd.f32 %v502_v21, %v501_v45  ;;  %v1026_v61 = vpop.permute.xlu0 %1025 }
 0x3c6   :  { %v919_v5 = vrot.slane %v918_v63, 1  ;;  %v553_v51 = vadd.f32 1e-09, %v503_v44 }
 0x3c8   :  { %v920_v9 = vadd.f32 %v919_v5, %v918_v63  ;;  %1492 = vrcp.f32 %v553_v51 }
 0x3ca   :  { %v970_v37 = vadd.f32 1e-09, %v920_v9 }
 0x3cc   :  { %1494 = vrcp.f32 %v970_v37 }
 0x3d2   :  { %v1493_v10 = vpop.eup %1492 }
 0x3d6   :  { %v1495_v38 = vpop.eup %1494 }
 0x48b   :  { %v1305_v11 = vpop.f32.mrb[16].mxu1 }
 0x48c   :  { %v557_v39 = vmul.f32 %v1493_v10, %v1305_v11  ;;  %v538_v46 = vpop.f32.mrb[17].mxu1 }
 0x48d   :  { %v555_v48 = vmul.f32 %v1493_v10, %v538_v46  ;;  %v1306_v54 = vpop.f32.mrb[18].mxu1 }
 0x48e   :  { %v565_v25 = vsub.f32 %v561_v3, %v557_v39  ;;  %v558_v50 = vmul.f32 %v1493_v10, %v1306_v54  ;;  %v541_v14 = vpop.f32.mrb[19].mxu1 }
 0x48f   :  { %v1343_v33 = vpop.f32.mrb[28].mxu0  ;;  %v563_v62 = vsub.f32 %v559_v6, %v555_v48  ;;  %v556_v29 = vmul.f32 %v1493_v10, %v541_v14  ;;  %v1036_v10 = vpop.permute.xlu0 %1035 }
 0x490   :  { %v974_v30 = vmul.f32 %v1495_v38, %v1343_v33  ;;  %v955_v34 = vpop.f32.mrb[29].mxu0  ;;  %v1221_v31 = vpack.c.bf16 %v565_v25, %v565_v25  ;;  %v566_v27 = vsub.f32 %v562_v42, %v558_v50 }
 0x491   :  { %v972_v32 = vmul.f32 %v1495_v38, %v955_v34  ;;  %v1344_v1 = vpop.f32.mrb[30].mxu0  ;;  %v1219_v16 = vpack.c.bf16 %v563_v62, %v563_v62  ;;  %v564_v55 = vsub.f32 %v560_v52, %v556_v29 }
 0x492   :  { %v983_v12 = vsub.f32 %v1200_v23, %v974_v30  ;;  %v975_v36 = vmul.f32 %v1495_v38, %v1344_v1  ;;  %v958_v40 = vpop.f32.mrb[31].mxu0  ;;  %585 = vst [vmem:[#allocation4 + $0x10] sm:$0xf] %v1221_v31  ;;  %v1222_v22 = vpack.c.bf16 %v566_v27, %v566_v27 }
 0x493   :  { %v981_v49 = vsub.f32 %v1198_v19, %v972_v32  ;;  %v973_v26 = vmul.f32 %v1495_v38, %v958_v40  ;;  %583 = vst [vmem:[#allocation4] sm:$0xf] %v1219_v16  ;;  %v1220_v47 = vpack.c.bf16 %v564_v55, %v564_v55 }
 0x494   :  { %v1225_v53 = vpack.c.bf16 %v983_v12, %v983_v12  ;;  %v984_v58 = vsub.f32 %v1201_v28, %v975_v36  ;;  %586 = vst [vmem:[#allocation4 + $0x18] sm:$0xf] %v1222_v22 }
 0x495   :  { %v1223_v8 = vpack.c.bf16 %v981_v49, %v981_v49  ;;  %v982_v15 = vsub.f32 %v1199_v43, %v973_v26  ;;  %584 = vst [vmem:[#allocation4 + $0x8] sm:$0xf] %v1220_v47 }
 0x496   :  { %1004 = vst [vmem:[#allocation4 + $0x14] sm:$0xf] %v1225_v53  ;;  %v1226_v24 = vpack.c.bf16 %v984_v58, %v984_v58 }
 0x497   :  { %1002 = vst [vmem:[#allocation4 + $0x4] sm:$0xf] %v1223_v8  ;;  %v1224_v20 = vpack.c.bf16 %v982_v15, %v982_v15 }
 0x498   :  { %1005 = vst [vmem:[#allocation4 + $0x1c] sm:$0xf] %v1226_v24 }
 0x499   :  { %1003 = vst [vmem:[#allocation4 + $0xc] sm:$0xf] %v1224_v20 }
 0x49b   :  { %v1361_v13 = vld [vmem:[#allocation4 + $0x10] ss:$8 sps:$4 sm:$0xff]  }
 0x49c   :  { %v1358_v0 = vld [vmem:[#allocation4] ss:$8 sps:$4 sm:$0xff]  }
 0x49f   :  { %v1359_v2 = vld [vmem:[#allocation4 + $0x14] ss:$8 sps:$4 sm:$0xff]  }
 0x4a0   :  { %v1356_v18 = vld [vmem:[#allocation4 + $0x4] ss:$8 sps:$4 sm:$0xff]  }
 0x4a1   :  { %1074 = vmatprep.subr.bf16.mxu1 %v1356_v18 }
 0x4a2   :  { %1075 = vmatpush1.bf16.msra.mxu1 %v1358_v0 }
 0x4a3   :  { %1076 = vmatprep.subr.bf16.mxu1 %v1359_v2 }
 0x4a6   :  { %1077 = vmatpush1.bf16.msra.mxu1 %v1361_v13 }
 0x4a9   :  { %1212 = vmatmul.mubr.msk.bf16.vlgmr.msra.gmra.mrb[20].mxu1 %vm82_vm0, %v1362_v60 }
 0x4aa   :  { %1116 = vmatprep.mubr.bf16.mxu1 %v1520_v7  ;;  %v1031_v7 = vpop.permute.xlu1 %1030 }
 0x4b1   :  { %1213 = vmatmul.mubr.msk.bf16.gmra.mrb[24].mxu1 %vm82_vm0, %v1363_v35 }
 0x57c   :  { %v1108_v4 = vpop.f32.mrb[20].mxu1 }
 0x57d   :  { %v1109_v59 = vadd.f32 %v1108_v4, %v1021_v17  ;;  %v1110_v57 = vpop.f32.mrb[21].mxu1 }
 0x57e   :  { %v1111_v41 = vadd.f32 %v1110_v57, %v1021_v17  ;;  %v1112_v56 = vpop.f32.mrb[22].mxu1 }
 0x57f   :  { %v1113_v45 = vadd.f32 %v1112_v56, %v1026_v61  ;;  %v1114_v63 = vpop.f32.mrb[23].mxu1 }
 0x580   :  { %v1227_v21 = vpack.c.bf16 %v1111_v41, %v1109_v59  ;;  %v1115_v5 = vadd.f32 %v1114_v63, %v1026_v61 }
 0x582   :  { %1151 = vst [vmem:[#allocation4] sm:$0xff] %v1227_v21  ;;  %v1228_v44 = vpack.c.bf16 %v1115_v5, %v1113_v45 }
 0x584   :  { %1152 = vst [vmem:[#allocation4 + $0x8] sm:$0xff] %v1228_v44  ;;  %v1118_v9 = vpop.f32.mrb[24].mxu1 }
 0x585   :  { %v1119_v51 = vadd.f32 %v1118_v9, %v1031_v7  ;;  %v1120_v37 = vpop.f32.mrb[25].mxu1 }
 0x586   :  { %v1121_v11 = vadd.f32 %v1120_v37, %v1031_v7  ;;  %v1122_v3 = vpop.f32.mrb[26].mxu1 }
 0x587   :  { %v1123_v39 = vadd.f32 %v1122_v3, %v1036_v10  ;;  %v1124_v46 = vpop.f32.mrb[27].mxu1 }
 0x588   :  { %v1229_v6 = vpack.c.bf16 %v1121_v11, %v1119_v51  ;;  %v1125_v48 = vadd.f32 %v1124_v46, %v1036_v10 }
 0x58a   :  { %1153 = vst [vmem:[#allocation4 + $0x10] sm:$0xff] %v1229_v6  ;;  %v1230_v54 = vpack.c.bf16 %v1125_v48, %v1123_v39 }
 0x58c   :  { %1154 = vst [vmem:[#allocation4 + $0x18] sm:$0xff] %v1230_v54 }
 0x58d   :  { %1507 = shalt.err (!%p1504_p4)
}
 0x58e   :  { %s1508_s27 = scalar_lea.hbm %s1978_s5, 512 }
 0x58f   :  { %p1509_p5 = scmp.ne.s32.totalorder %s1978_s5, %s1508_s27  ;;  %p1512_p6 = scmp.lt.u32.totalorder %s1508_s27, %s1978_s5 }
 0x591   :  { %p1514_p7 = pnand %p1512_p6, %p1509_p5 }
 0x593   :  { %1517 = shalt.err (!%p1514_p7)
}
 0x594   :  { %s1522_s2 = smov 128   ;;  %s1523_s4 = smov 8  }
 0x595   :  { %1166 = dma.vmem_to_hbm [thread:$0]  %s1161_s23, 512, %s1978_s5, [#allocation5], %s1522_s2, %s1522_s2, %s1523_s4  }
 0x596   :  { %1518 = dma.done.wait [#allocation5], 512  }
 0x597   :  { %1519 = vsyncadd [#allocation5], 4294966784 }
 0x598   :  { %1170 = vsyncpa [#allocation5], 1 }

</bundles_post_ra>
